<compile_context>
chip_gen: v5e
topology: v5e:2x2
jax: 0.10.0
libtpu: 0.0.40
codegen_flags: <defaults>
</compile_context>

<pallas_src>
import functools

import jax
import jax.numpy as jnp
from jax.experimental import pallas as pl
from jax.experimental.pallas import tpu as pltpu


def _mlp_kernel(x_ref, w1_ref, b1_ref, w2_ref, b2_ref, w3_ref, b3_ref,
                *rest, compute_dtype):
    """One batch tile, feature-major: x (7, TB) -> out (3, TB)."""
    if len(rest) == 3:                       # training mode: dropout scale masks
        s1_ref, s2_ref, o_ref = rest
    else:                                    # eval mode
        s1_ref = s2_ref = None
        (o_ref,) = rest

    cd = compute_dtype
    x = x_ref[...].astype(cd)                                    # (7, TB)

    h1 = jnp.dot(w1_ref[...].astype(cd), x,
                 preferred_element_type=jnp.float32)             # (128, TB)
    h1 = jnp.maximum(h1 + b1_ref[...], 0.0)
    if s1_ref is not None:
        h1 = h1 * s1_ref[...]                                    # keep * 1/(1-p) folded in

    h2 = jnp.dot(w2_ref[...].astype(cd), h1.astype(cd),
                 preferred_element_type=jnp.float32)             # (64, TB)
    h2 = jnp.maximum(h2 + b2_ref[...], 0.0)
    if s2_ref is not None:
        h2 = h2 * s2_ref[...]

    h3 = jnp.dot(w3_ref[...].astype(cd), h2.astype(cd),
                 preferred_element_type=jnp.float32)             # (3, TB)
    o_ref[...] = (h3 + b3_ref[...]).astype(o_ref.dtype)


def nn2_forward(x, params, *, dropout_p=0.0, rng_key=None,
                tile_b=1024, compute_dtype=jnp.float32):
    """Pallas-backed NN2.forward.  x: (B, 7) float32 -> (B, 3) float32.

    params are PyTorch-native shapes: W1 (128,7), b1 (128,), W2 (64,128),
    b2 (64,), W3 (3,64), b3 (3,).  dropout_p>0 => training-mode inverted dropout.
    """
    w1, b1, w2, b2, w3, b3 = params
    assert 0.0 <= dropout_p < 1.0, "dropout_p must be in [0, 1)"
    B = x.shape[0]
    training = dropout_p > 0.0
    if training and rng_key is None:
        raise ValueError("rng_key is required when dropout_p > 0")

    # Feature-major: batch on the lane (last) axis.
    xT = x.T                                                     # (7, B)

    if B <= tile_b:
        tile, Bp = B, B
    else:
        assert tile_b % 128 == 0, "tile_b must be a multiple of 128"
        tile = tile_b
        Bp = tile * pl.cdiv(B, tile)
    if Bp != B:
        xT = jnp.pad(xT, ((0, 0), (0, Bp - B)))
    grid = (Bp // tile,)

    b1c, b2c, b3c = b1.reshape(-1, 1), b2.reshape(-1, 1), b3.reshape(-1, 1)

    def const(shape):                       # weights/biases: VMEM-resident, fetched once
        return pl.BlockSpec(shape, lambda i: (0, 0))

    in_specs = [
        pl.BlockSpec((7, tile), lambda i: (0, i)),   # x tile (batch on lanes)
        const(w1.shape), const(b1c.shape),
        const(w2.shape), const(b2c.shape),
        const(w3.shape), const(b3c.shape),
    ]
    inputs = [xT, w1, b1c, w2, b2c, w3, b3c]

    if training:
        scale = 1.0 / (1.0 - dropout_p)
        k1, k2 = jax.random.split(rng_key)
        s1 = (jax.random.uniform(k1, (128, Bp)) >= dropout_p).astype(jnp.float32) * scale
        s2 = (jax.random.uniform(k2, (64, Bp)) >= dropout_p).astype(jnp.float32) * scale
        in_specs += [pl.BlockSpec((128, tile), lambda i: (0, i)),
                     pl.BlockSpec((64, tile), lambda i: (0, i))]
        inputs += [s1, s2]

    out = pl.pallas_call(
        functools.partial(_mlp_kernel, compute_dtype=compute_dtype),
        out_shape=jax.ShapeDtypeStruct((3, Bp), x.dtype),
        grid_spec=pltpu.PrefetchScalarGridSpec(
            num_scalar_prefetch=0,
            grid=grid,
            in_specs=in_specs,
            out_specs=pl.BlockSpec((3, tile), lambda i: (0, i)),
        ),
        compiler_params=pltpu.CompilerParams(
            dimension_semantics=("parallel",)),
    )(*inputs)

    return out[:, :B].T                                          # back to (B, 3)


def init_params(key):
    """nn.Linear-style init, PyTorch-native (out_features, in_features) shapes."""
    dims = [(7, 128), (128, 64), (64, 3)]
    params = []
    for fan_in, fan_out in dims:
        key, kw, kb = jax.random.split(key, 3)
        bound = 1.0 / jnp.sqrt(fan_in)
        w = jax.random.uniform(kw, (fan_out, fan_in), jnp.float32, -bound, bound)
        b = jax.random.uniform(kb, (fan_out,), jnp.float32, -bound, bound)
        params += [w, b]
    return tuple(params)


def nn2_reference(x, params):
    """Plain-JAX reference (eval mode / dropout off)."""
    w1, b1, w2, b2, w3, b3 = params
    h = jnp.maximum(x @ w1.T + b1, 0.0)
    h = jnp.maximum(h @ w2.T + b2, 0.0)
    return h @ w3.T + b3


if __name__ == "__main__":
    key = jax.random.PRNGKey(0)
    key, kx, kd = jax.random.split(key, 3)

    # small batch, single tile
    B = 8
    x = jax.random.normal(kx, (B, 7), jnp.float32)
    params = init_params(key)

    y_eval = jax.block_until_ready(nn2_forward(x, params, dropout_p=0.0))
    y_ref = nn2_reference(x, params)
    assert y_eval.shape == (B, 3)
    assert jnp.allclose(y_eval, y_ref, atol=1e-5, rtol=1e-5), "mismatch vs reference"

    # training mode (dropout active, mask folded into one in-kernel multiply)
    y_train = jax.block_until_ready(nn2_forward(x, params, dropout_p=0.5, rng_key=kd))
    assert y_train.shape == (B, 3)
    assert bool(jnp.all(jnp.isfinite(y_train)))

    # larger batch exercising the tiled, pipelined, parallel grid (2 tiles)
    B2 = 512
    x2 = jax.random.normal(kx, (B2, 7), jnp.float32)
    y2 = jax.block_until_ready(nn2_forward(x2, params, dropout_p=0.0, tile_b=256))
    assert jnp.allclose(y2, nn2_reference(x2, params), atol=1e-5, rtol=1e-5)

    # bf16 MXU path (v6e/v7x optimization); f32 accumulation, loose check
    y_bf16 = jax.block_until_ready(
        nn2_forward(x2, params, dropout_p=0.0, tile_b=256,
                    compute_dtype=jnp.bfloat16))
    assert y_bf16.shape == (B2, 3)
    assert bool(jnp.all(jnp.isfinite(y_bf16)))

    print("KERNEL_OK")
</pallas_src>

<mosaic_0001>
module attributes {stable_mosaic.version = 11 : i64} {
  func.func @_mlp_kernel(%arg0: i32, %arg1: memref<7x8xf32, #tpu.memory_space<vmem>>, %arg2: memref<128x7xf32, #tpu.memory_space<vmem>>, %arg3: memref<128x1xf32, #tpu.memory_space<vmem>>, %arg4: memref<64x128xf32, #tpu.memory_space<vmem>>, %arg5: memref<64x1xf32, #tpu.memory_space<vmem>>, %arg6: memref<3x64xf32, #tpu.memory_space<vmem>>, %arg7: memref<3x1xf32, #tpu.memory_space<vmem>>, %arg8: memref<3x8xf32, #tpu.memory_space<vmem>>) attributes {dimension_semantics = [#tpu.dimension_semantics<parallel>], iteration_bounds = array<i64: 1>, scalar_prefetch = 0 : i64, scratch_operands = 0 : i64, tpu.core_type = #tpu.core_type<tc>, window_params = [{transform_indices = @transform_0, window_bounds = array<i64: 7, 8>}, {pipeline_mode = #tpu.pipeline_mode<synchronous>, transform_indices = @transform_1, window_bounds = array<i64: 128, 7>}, {pipeline_mode = #tpu.pipeline_mode<synchronous>, transform_indices = @transform_2, window_bounds = array<i64: 128, 1>}, {pipeline_mode = #tpu.pipeline_mode<synchronous>, transform_indices = @transform_3, window_bounds = array<i64: 64, 128>}, {pipeline_mode = #tpu.pipeline_mode<synchronous>, transform_indices = @transform_4, window_bounds = array<i64: 64, 1>}, {pipeline_mode = #tpu.pipeline_mode<synchronous>, transform_indices = @transform_5, window_bounds = array<i64: 3, 64>}, {pipeline_mode = #tpu.pipeline_mode<synchronous>, transform_indices = @transform_6, window_bounds = array<i64: 3, 1>}, {transform_indices = @transform_7, window_bounds = array<i64: 3, 8>}]} {
    %c0 = arith.constant 0 : index
    %c0_0 = arith.constant 0 : index
    %0 = vector.load %arg1[%c0, %c0_0] : memref<7x8xf32, #tpu.memory_space<vmem>>, vector<7x8xf32>
    %c0_1 = arith.constant 0 : index
    %c0_2 = arith.constant 0 : index
    %1 = vector.load %arg2[%c0_1, %c0_2] : memref<128x7xf32, #tpu.memory_space<vmem>>, vector<128x7xf32>
    %cst = arith.constant dense<0.000000e+00> : vector<128x8xf32>
    %2 = tpu.matmul %1, %0, %cst {dimension_numbers = #tpu.dot_dimension_numbers<[1], [0], [0], [1], [0, 0, 1, 1], [], []>} : vector<128x7xf32>, vector<7x8xf32>, vector<128x8xf32> -> vector<128x8xf32>
    %c0_3 = arith.constant 0 : index
    %c0_4 = arith.constant 0 : index
    %3 = vector.load %arg3[%c0_3, %c0_4] : memref<128x1xf32, #tpu.memory_space<vmem>>, vector<128x1xf32>
    %4 = vector.broadcast %3 : vector<128x1xf32> to vector<128x8xf32>
    %5 = arith.addf %2, %4 : vector<128x8xf32>
    %cst_5 = arith.constant 0.000000e+00 : f32
    %6 = vector.broadcast %cst_5 : f32 to vector<128x8xf32>
    %7 = arith.maximumf %5, %6 : vector<128x8xf32>
    %c0_6 = arith.constant 0 : index
    %c0_7 = arith.constant 0 : index
    %8 = vector.load %arg4[%c0_6, %c0_7] : memref<64x128xf32, #tpu.memory_space<vmem>>, vector<64x128xf32>
    %cst_8 = arith.constant dense<0.000000e+00> : vector<64x8xf32>
    %9 = tpu.matmul %8, %7, %cst_8 {dimension_numbers = #tpu.dot_dimension_numbers<[1], [0], [0], [1], [0, 0, 1, 1], [], []>} : vector<64x128xf32>, vector<128x8xf32>, vector<64x8xf32> -> vector<64x8xf32>
    %c0_9 = arith.constant 0 : index
    %c0_10 = arith.constant 0 : index
    %10 = vector.load %arg5[%c0_9, %c0_10] : memref<64x1xf32, #tpu.memory_space<vmem>>, vector<64x1xf32>
    %11 = vector.broadcast %10 : vector<64x1xf32> to vector<64x8xf32>
    %12 = arith.addf %9, %11 : vector<64x8xf32>
    %cst_11 = arith.constant 0.000000e+00 : f32
    %13 = vector.broadcast %cst_11 : f32 to vector<64x8xf32>
    %14 = arith.maximumf %12, %13 : vector<64x8xf32>
    %c0_12 = arith.constant 0 : index
    %c0_13 = arith.constant 0 : index
    %15 = vector.load %arg6[%c0_12, %c0_13] : memref<3x64xf32, #tpu.memory_space<vmem>>, vector<3x64xf32>
    %cst_14 = arith.constant dense<0.000000e+00> : vector<3x8xf32>
    %16 = tpu.matmul %15, %14, %cst_14 {dimension_numbers = #tpu.dot_dimension_numbers<[1], [0], [0], [1], [0, 0, 1, 1], [], []>} : vector<3x64xf32>, vector<64x8xf32>, vector<3x8xf32> -> vector<3x8xf32>
    %c0_15 = arith.constant 0 : index
    %c0_16 = arith.constant 0 : index
    %17 = vector.load %arg7[%c0_15, %c0_16] : memref<3x1xf32, #tpu.memory_space<vmem>>, vector<3x1xf32>
    %18 = vector.broadcast %17 : vector<3x1xf32> to vector<3x8xf32>
    %19 = arith.addf %16, %18 : vector<3x8xf32>
    %c0_17 = arith.constant 0 : index
    %c0_18 = arith.constant 0 : index
    %20 = vector.load %arg8[%c0_17, %c0_18] : memref<3x8xf32, #tpu.memory_space<vmem>>, vector<3x8xf32>
    tpu.vector_store %arg8[%c0_17, %c0_18], %19 {strides = array<i32>} : memref<3x8xf32, #tpu.memory_space<vmem>>, vector<3x8xf32>,
    return
  }
  func.func @transform_0(%arg0: i32) -> (i32, i32) {
    %c0_i32 = arith.constant 0 : i32
    %c0_i32_0 = arith.constant 0 : i32
    return %c0_i32, %arg0 : i32, i32
  }
  func.func @transform_1(%arg0: i32) -> (i32, i32) {
    %c0_i32 = arith.constant 0 : i32
    %c0_i32_0 = arith.constant 0 : i32
    %c0_i32_1 = arith.constant 0 : i32
    return %c0_i32, %c0_i32_0 : i32, i32
  }
  func.func @transform_2(%arg0: i32) -> (i32, i32) {
    %c0_i32 = arith.constant 0 : i32
    %c0_i32_0 = arith.constant 0 : i32
    %c0_i32_1 = arith.constant 0 : i32
    return %c0_i32, %c0_i32_0 : i32, i32
  }
  func.func @transform_3(%arg0: i32) -> (i32, i32) {
    %c0_i32 = arith.constant 0 : i32
    %c0_i32_0 = arith.constant 0 : i32
    %c0_i32_1 = arith.constant 0 : i32
    return %c0_i32, %c0_i32_0 : i32, i32
  }
  func.func @transform_4(%arg0: i32) -> (i32, i32) {
    %c0_i32 = arith.constant 0 : i32
    %c0_i32_0 = arith.constant 0 : i32
    %c0_i32_1 = arith.constant 0 : i32
    return %c0_i32, %c0_i32_0 : i32, i32
  }
  func.func @transform_5(%arg0: i32) -> (i32, i32) {
    %c0_i32 = arith.constant 0 : i32
    %c0_i32_0 = arith.constant 0 : i32
    %c0_i32_1 = arith.constant 0 : i32
    return %c0_i32, %c0_i32_0 : i32, i32
  }
  func.func @transform_6(%arg0: i32) -> (i32, i32) {
    %c0_i32 = arith.constant 0 : i32
    %c0_i32_0 = arith.constant 0 : i32
    %c0_i32_1 = arith.constant 0 : i32
    return %c0_i32, %c0_i32_0 : i32, i32
  }
  func.func @transform_7(%arg0: i32) -> (i32, i32) {
    %c0_i32 = arith.constant 0 : i32
    %c0_i32_0 = arith.constant 0 : i32
    return %c0_i32, %arg0 : i32, i32
  }
}

</mosaic_0001>

<bundles_post_ra>
// kernel: tpu_custom_call.1
= control target key start
LH: loop header
LB: loop body
LE: loop exit
PB: predicated region body
PF: predicated region fallthrough
CT: control target
= control target key end

     0   :  { %vm189_vm0 = vcmask 1046528   ;;  %v494_v3 = vmov 0   ;;  %vm140_vm1 = vcmask 56320   ;;  %s717_s0 = inlined_call_operand.vmem [shape: f32[7,8], index: 0, kind: input, shape index: {}]   ;;  %s718_s1 = inlined_call_operand.vmem [shape: f32[128,7], index: 1, kind: input, shape index: {}]   ;;  %s719_s2 = inlined_call_operand.vmem [shape: f32[128,1], index: 2, kind: input, shape index: {}]   ;;  %s720_s3 = inlined_call_operand.vmem [shape: f32[64,128], index: 3, kind: input, shape index: {}]   ;;  %s721_s4 = inlined_call_operand.vmem [shape: f32[64,1], index: 4, kind: input, shape index: {}]   ;;  %s722_s5 = inlined_call_operand.vmem [shape: f32[3,64], index: 5, kind: input, shape index: {}]   ;;  %s723_s6 = inlined_call_operand.vmem [shape: f32[3,1], index: 6, kind: input, shape index: {}]   ;;  %s724_s7 = inlined_call_operand.hbm [shape: f32[3,8], index: 7, kind: output, shape index: {}]  }
   0x1   :  { %v27_v0 = vld [vmem:[%s717_s0] sm:$0x7f]  ;;  %v59_v1 = vld [vmem:[%s719_s2 + $0x78] sm:$0xff]  ;;  %465 = vset.pattern.permute.xlu0 %v494_v3  ;;  %v57_v4 = vld [vmem:[%s719_s2 + $0x68] sm:$0xff]  ;;  %466 = vset.pattern.permute.xlu1 %v494_v3 }
   0x2   :  { %v36_v2 = vld [vmem:[%s718_s1 + $0x40] sm:$0xff]  ;;  %446 = vmatpush.msk.msra.mxu3 %vm189_vm0, %v27_v0  ;;  %137 = vperm.xlu0 %465, %v59_v1   ;;  %v55_v6 = vld [vmem:[%s719_s2 + $0x58] sm:$0xff]  ;;  %v58_v7 = vld [vmem:[%s719_s2 + $0x70] sm:$0xff] }
   0x3   :  { %v28_v5 = vld [vmem:[%s718_s1] sm:$0xff]  ;;  %437 = vmatmul.msk.f32.vlgmr.msra.gmra.mxu3 %vm140_vm1, %v36_v2  ;;  %127 = vperm.xlu1 %466, %v57_v4  }
   0x4   :  { %428 = vmatpush.msk.msra.mxu0 %vm189_vm0, %v27_v0  ;;  %467 = vset.pattern.permute.xlu2 %v494_v3 }
   0x5   :  { %429 = vmatmul.msk.f32.vlgmr.msra.gmra.mxu0 %vm140_vm1, %v28_v5  ;;  %117 = vperm.xlu2 %467, %v55_v6  }
   0x6   :  { %12 = vsyncpa [#allocation3], 0  ;;  %v37_v8 = vld [vmem:[%s718_s1 + $0x48] sm:$0xff]  ;;  %v56_v9 = vld [vmem:[%s719_s2 + $0x60] sm:$0xff]  ;;  %vm386_vm2 = vcmask 523264   ;;  %s495_s24 = smov [#allocation2]  }
   0x7   :  { %v29_v10 = vld [vmem:[%s718_s1 + $0x8] sm:$0xff]  ;;  %v54_v11 = vld [vmem:[%s719_s2 + $0x50] sm:$0xff]  ;;  %v52_v14 = vld [vmem:[%s719_s2 + $0x40] sm:$0xff]  ;;  %s417_s25 = sshll.u32 %s495_s24, 4  ;;  %s419_s28 = sshll.u32 %s724_s7, 4  ;;  %vm410_vm3 = vcmask 59392   ;;  %s418_s25 = int_to_ptr.vmem [resolvable:$true] %s417_s25  ;;  %s420_s28 = int_to_ptr.hbm [resolvable:$true] %s419_s28 }
   0x8   :  { %v53_v12 = vld [vmem:[%s719_s2 + $0x48] sm:$0xff]  ;;  %v38_v13 = vld [vmem:[%s718_s1 + $0x50] sm:$0xff]  ;;  %v51_v16 = vld [vmem:[%s719_s2 + $0x38] sm:$0xff] }
   0x9   :  { %v30_v15 = vld [vmem:[%s718_s1 + $0x10] sm:$0xff]  ;;  %v39_v18 = vld [vmem:[%s718_s1 + $0x58] sm:$0xff]  ;;  %v49_v19 = vld [vmem:[%s719_s2 + $0x28] sm:$0xff] }
   0xa   :  { %132 = vperm.xlu0 %465, %v58_v7   ;;  %v50_v17 = vld [vmem:[%s719_s2 + $0x30] sm:$0xff]  ;;  %v31_v20 = vld [vmem:[%s718_s1 + $0x18] sm:$0xff]  ;;  %v48_v21 = vld [vmem:[%s719_s2 + $0x20] sm:$0xff] }
   0xb   :  { %438 = vmatmul.msk.f32.gmra.mxu3 %vm140_vm1, %v37_v8  ;;  %122 = vperm.xlu1 %466, %v56_v9   ;;  %v47_v22 = vld [vmem:[%s719_s2 + $0x18] sm:$0xff]  ;;  %v40_v23 = vld [vmem:[%s718_s1 + $0x60] sm:$0xff]  ;;  %v46_v24 = vld [vmem:[%s719_s2 + $0x10] sm:$0xff] }
   0xc   :  { %v32_v25 = vld [vmem:[%s718_s1 + $0x20] sm:$0xff]  ;;  %v45_v26 = vld [vmem:[%s719_s2 + $0x8] sm:$0xff]  ;;  %v289_v29 = vld [vmem:[%s721_s4 + $0x38] sm:$0xff] }
   0xd   :  { %430 = vmatmul.msk.f32.gmra.mxu0 %vm140_vm1, %v29_v10  ;;  %112 = vperm.xlu2 %467, %v54_v11   ;;  %v44_v27 = vld [vmem:[%s719_s2] sm:$0xff]  ;;  %v41_v28 = vld [vmem:[%s718_s1 + $0x68] sm:$0xff]  ;;  %v288_v31 = vld [vmem:[%s721_s4 + $0x30] sm:$0xff] }
   0xe   :  { %v33_v30 = vld [vmem:[%s718_s1 + $0x28] sm:$0xff]  ;;  %v42_v33 = vld [vmem:[%s718_s1 + $0x70] sm:$0xff]  ;;  %v286_v34 = vld [vmem:[%s721_s4 + $0x20] sm:$0xff] }
   0xf   :  { %v287_v32 = vld [vmem:[%s721_s4 + $0x28] sm:$0xff]  ;;  %v34_v35 = vld [vmem:[%s718_s1 + $0x30] sm:$0xff]  ;;  %v285_v36 = vld [vmem:[%s721_s4 + $0x18] sm:$0xff] }
  0x10   :  { %v284_v37 = vld [vmem:[%s721_s4 + $0x10] sm:$0xff]  ;;  %v43_v38 = vld [vmem:[%s718_s1 + $0x78] sm:$0xff]  ;;  %v283_v39 = vld [vmem:[%s721_s4 + $0x8] sm:$0xff] }
  0x11   :  { %v35_v40 = vld [vmem:[%s718_s1 + $0x38] sm:$0xff]  ;;  %v282_v41 = vld [vmem:[%s721_s4] sm:$0xff] }
  0x12   :  { %107 = vperm.xlu0 %465, %v53_v12   ;;  %v380_v42 = vld [vmem:[%s723_s6] sm:$0x7] }
  0x13   :  { %439 = vmatmul.msk.f32.gmra.mxu3 %vm140_vm1, %v38_v13  ;;  %102 = vperm.xlu1 %466, %v52_v14  }
  0x15   :  { %431 = vmatmul.msk.f32.gmra.mxu0 %vm140_vm1, %v30_v15  ;;  %97 = vperm.xlu2 %467, %v51_v16  }
  0x1a   :  { %92 = vperm.xlu0 %465, %v50_v17  }
  0x1b   :  { %440 = vmatmul.msk.f32.gmra.mxu3 %vm140_vm1, %v39_v18  ;;  %87 = vperm.xlu1 %466, %v49_v19  }
  0x1d   :  { %432 = vmatmul.msk.f32.gmra.mxu0 %vm140_vm1, %v31_v20  ;;  %82 = vperm.xlu2 %467, %v48_v21  }
  0x22   :  { %77 = vperm.xlu0 %465, %v47_v22  }
  0x23   :  { %441 = vmatmul.msk.f32.gmra.mxu3 %vm140_vm1, %v40_v23  ;;  %72 = vperm.xlu1 %466, %v46_v24  }
  0x25   :  { %433 = vmatmul.msk.f32.gmra.mxu0 %vm140_vm1, %v32_v25  ;;  %67 = vperm.xlu2 %467, %v45_v26  }
  0x2a   :  { %62 = vperm.xlu0 %465, %v44_v27  }
  0x2b   :  { %442 = vmatmul.msk.f32.gmra.mxu3 %vm140_vm1, %v41_v28  ;;  %327 = vperm.xlu1 %466, %v289_v29  }
  0x2d   :  { %434 = vmatmul.msk.f32.gmra.mxu0 %vm140_vm1, %v33_v30  ;;  %322 = vperm.xlu2 %467, %v288_v31  }
  0x32   :  { %317 = vperm.xlu0 %465, %v287_v32  }
  0x33   :  { %443 = vmatmul.msk.f32.gmra.mxu3 %vm140_vm1, %v42_v33  ;;  %312 = vperm.xlu1 %466, %v286_v34  }
  0x35   :  { %435 = vmatmul.msk.f32.gmra.mxu0 %vm140_vm1, %v34_v35  ;;  %307 = vperm.xlu2 %467, %v285_v36  }
  0x3a   :  { %302 = vperm.xlu0 %465, %v284_v37  }
  0x3b   :  { %444 = vmatmul.msk.f32.gmra.mxu3 %vm140_vm1, %v43_v38  ;;  %297 = vperm.xlu1 %466, %v283_v39  }
  0x3d   :  { %436 = vmatmul.msk.f32.gmra.mxu0 %vm140_vm1, %v35_v40  ;;  %292 = vperm.xlu2 %467, %v282_v41  }
  0x42   :  { %383 = vperm.xlu0 %465, %v380_v42  }
  0x5f   :  { %v118_v54 = vpop.permute.xlu2 %117 }
  0x67   :  { %v113_v60 = vpop.permute.xlu2 %112 }
  0x6f   :  { %v98_v5 = vpop.permute.xlu2 %97 }
  0x74   :  { %v138_v51 = vpop.permute.xlu0 %137 }
  0x75   :  { %v128_v56 = vpop.permute.xlu1 %127 }
  0x77   :  { %v83_v19 = vpop.permute.xlu2 %82 }
  0x7c   :  { %v133_v57 = vpop.permute.xlu0 %132 }
  0x7d   :  { %v123_v61 = vpop.permute.xlu1 %122 }
  0x7f   :  { %v68_v32 = vpop.permute.xlu2 %67 }
  0x82   :  { %v678_v43 = vpop.f32.mrf.mxu0 }
  0x84   :  { %v108_v62 = vpop.permute.xlu0 %107 }
  0x85   :  { %v103_v8 = vpop.permute.xlu1 %102 }
  0x86   :  { %v234_v44 = vpop.f32.mrf.mxu3 }
  0x87   :  { %v235_v17 = vadd.f32 %v234_v44, %v103_v8  ;;  %v274_v44 = vld [vmem:[%s720_s3] sm:$0xff] }
  0x89   :  { %v266_v24 = vmax.f32 %v235_v17, 0.0 }
  0x8a   :  { %v680_v45 = vpop.f32.mrf.mxu0 }
  0x8b   :  { %v214_v38 = vadd.f32 %v680_v45, %v68_v32  ;;  %v279_v45 = vld [vmem:[%s720_s3 + $0x28] sm:$0xff] }
  0x8c   :  { %v93_v9 = vpop.permute.xlu0 %92 }
  0x8d   :  { %v88_v20 = vpop.permute.xlu1 %87  ;;  %v259_v41 = vmax.f32 %v214_v38, 0.0 }
  0x8e   :  { %v237_v46 = vpop.f32.mrf.mxu3 }
  0x8f   :  { %v238_v14 = vadd.f32 %v237_v46, %v108_v62  ;;  %v280_v46 = vld [vmem:[%s720_s3 + $0x30] sm:$0xff] }
  0x91   :  { %v267_v21 = vmax.f32 %v238_v14, 0.0 }
  0x92   :  { %v682_v48 = vpop.f32.mrf.mxu0 }
  0x94   :  { %v78_v23 = vpop.permute.xlu0 %77 }
  0x95   :  { %v73_v33 = vpop.permute.xlu1 %72 }
  0x96   :  { %v240_v47 = vpop.f32.mrf.mxu3  ;;  %v217_v34 = vadd.f32 %v682_v48, %v73_v33  ;;  %v281_v48 = vld [vmem:[%s720_s3 + $0x38] sm:$0xff] }
  0x97   :  { %v241_v12 = vadd.f32 %v240_v47, %v113_v60  ;;  %v276_v47 = vld [vmem:[%s720_s3 + $0x10] sm:$0xff] }
  0x98   :  { %v260_v40 = vmax.f32 %v217_v34, 0.0 }
  0x99   :  { %v268_v18 = vmax.f32 %v241_v12, 0.0 }
  0x9a   :  { %v219_v50 = vpop.f32.mrf.mxu0 }
  0x9b   :  { %v220_v30 = vadd.f32 %v219_v50, %v78_v23  ;;  %v278_v50 = vld [vmem:[%s720_s3 + $0x20] sm:$0xff] }
  0x9c   :  { %v63_v36 = vpop.permute.xlu0 %62 }
  0x9d   :  { %v261_v37 = vmax.f32 %v220_v30, 0.0  ;;  %v211_v39 = vadd.f32 %v678_v43, %v63_v36  ;;  %v275_v43 = vld [vmem:[%s720_s3 + $0x8] sm:$0xff] }
  0x9e   :  { %v243_v49 = vpop.f32.mrf.mxu3 }
  0x9f   :  { %v244_v10 = vadd.f32 %v243_v49, %v118_v54  ;;  %v258_v42 = vmax.f32 %v211_v39, 0.0  ;;  %v277_v49 = vld [vmem:[%s720_s3 + $0x18] sm:$0xff] }
  0xa1   :  { %v269_v15 = vmax.f32 %v244_v10, 0.0 }
  0xa2   :  { %v222_v53 = vpop.f32.mrf.mxu0 }
  0xa3   :  { %v223_v28 = vadd.f32 %v222_v53, %v83_v19  ;;  %v379_v19 = vld [vmem:[%s722_s5] sm:$0x7] }
  0xa5   :  { %v262_v35 = vmax.f32 %v223_v28, 0.0 }
  0xa6   :  { %v246_v52 = vpop.f32.mrf.mxu3 }
  0xa7   :  { %v247_v6 = vadd.f32 %v246_v52, %v123_v61  ;;  %v318_v61 = vpop.permute.xlu0 %317 }
  0xa9   :  { %v270_v13 = vmax.f32 %v247_v6, 0.0 }
  0xaa   :  { %v225_v58 = vpop.f32.mrf.mxu0 }
  0xab   :  { %v226_v26 = vadd.f32 %v225_v58, %v88_v20 }
  0xad   :  { %v263_v31 = vmax.f32 %v226_v26, 0.0 }
  0xae   :  { %v249_v55 = vpop.f32.mrf.mxu3 }
  0xaf   :  { %v250_v3 = vadd.f32 %v249_v55, %v128_v56  ;;  %v328_v55 = vpop.permute.xlu1 %327  ;;  %v303_v8 = vpop.permute.xlu0 %302 }
  0xb1   :  { %v271_v11 = vmax.f32 %v250_v3, 0.0 }
  0xb2   :  { %v228_v2 = vpop.f32.mrf.mxu0 }
  0xb3   :  { %v229_v25 = vadd.f32 %v228_v2, %v93_v9 }
  0xb5   :  { %v264_v29 = vmax.f32 %v229_v25, 0.0 }
  0xb6   :  { %v252_v59 = vpop.f32.mrf.mxu3 }
  0xb7   :  { %v253_v0 = vadd.f32 %v252_v59, %v133_v57  ;;  %v323_v57 = vpop.permute.xlu2 %322  ;;  %v384_v20 = vpop.permute.xlu0 %383 }
  0xb9   :  { %v272_v7 = vmax.f32 %v253_v0, 0.0 }
  0xba   :  { %v231_v16 = vpop.f32.mrf.mxu0 }
  0xbb   :  { %v232_v22 = vadd.f32 %v231_v16, %v98_v5 }
  0xbd   :  { %v265_v27 = vmax.f32 %v232_v22, 0.0 }
  0xbe   :  { %v255_v63 = vpop.f32.mrf.mxu3 }
  0xbf   :  { %v256_v1 = vadd.f32 %v255_v63, %v138_v51  ;;  %v308_v3 = vpop.permute.xlu2 %307 }
  0xc1   :  { %v273_v4 = vmax.f32 %v256_v1, 0.0  ;;  %v313_v1 = vpop.permute.xlu1 %312 }
  0xc3   :  { %330 = vmatpush.msra.mxu1 %v273_v4  ;;  %447 = vmatpush.msra.mxu2 %v273_v4 }
  0xc5   :  { %331 = vmatpush.msra.mxu1 %v272_v7  ;;  %448 = vmatpush.msra.mxu2 %v272_v7 }
  0xc7   :  { %332 = vmatpush.msra.mxu1 %v271_v11  ;;  %449 = vmatpush.msra.mxu2 %v271_v11  ;;  %v293_v14 = vpop.permute.xlu2 %292 }
  0xc9   :  { %333 = vmatpush.msra.mxu1 %v270_v13  ;;  %450 = vmatpush.msra.mxu2 %v270_v13  ;;  %v298_v11 = vpop.permute.xlu1 %297 }
  0xcb   :  { %334 = vmatpush.msra.mxu1 %v269_v15  ;;  %451 = vmatpush.msra.mxu2 %v269_v15 }
  0xcd   :  { %335 = vmatpush.msra.mxu1 %v268_v18  ;;  %452 = vmatpush.msra.mxu2 %v268_v18 }
  0xcf   :  { %336 = vmatpush.msra.mxu1 %v267_v21  ;;  %453 = vmatpush.msra.mxu2 %v267_v21 }
  0xd1   :  { %337 = vmatpush.msra.mxu1 %v266_v24  ;;  %454 = vmatpush.msra.mxu2 %v266_v24 }
  0xd3   :  { %338 = vmatpush.msra.mxu1 %v265_v27  ;;  %455 = vmatpush.msra.mxu2 %v265_v27 }
  0xd5   :  { %339 = vmatpush.msra.mxu1 %v264_v29  ;;  %456 = vmatpush.msra.mxu2 %v264_v29 }
  0xd7   :  { %340 = vmatpush.msra.mxu1 %v263_v31  ;;  %457 = vmatpush.msra.mxu2 %v263_v31 }
  0xd9   :  { %341 = vmatpush.msra.mxu1 %v262_v35  ;;  %458 = vmatpush.msra.mxu2 %v262_v35 }
  0xdb   :  { %342 = vmatpush.msra.mxu1 %v261_v37  ;;  %459 = vmatpush.msra.mxu2 %v261_v37 }
  0xdd   :  { %343 = vmatpush.msra.mxu1 %v260_v40  ;;  %460 = vmatpush.msra.mxu2 %v260_v40 }
  0xdf   :  { %344 = vmatpush.msra.mxu1 %v259_v41  ;;  %461 = vmatpush.msra.mxu2 %v259_v41 }
  0xe1   :  { %345 = vmatpush.msra.mxu1 %v258_v42  ;;  %462 = vmatpush.msra.mxu2 %v258_v42 }
  0xe2   :  { %346 = vmatmul.f32.vlgmr.msra.gmra.mxu1 %v274_v44  ;;  %361 = vmatmul.f32.vlgmr.msra.gmra.mxu2 %v279_v45 }
  0xea   :  { %349 = vmatmul.f32.gmra.mxu1 %v275_v43  ;;  %364 = vmatmul.f32.gmra.mxu2 %v280_v46 }
  0xf2   :  { %352 = vmatmul.f32.gmra.mxu1 %v276_v47  ;;  %367 = vmatmul.f32.gmra.mxu2 %v281_v48 }
  0xfa   :  { %355 = vmatmul.f32.gmra.mxu1 %v277_v49 }
 0x102   :  { %358 = vmatmul.f32.gmra.mxu1 %v278_v50 }
 0x15f   :  { %v347_v51 = vpop.f32.mrf.mxu1 }
 0x160   :  { %v348_v15 = vadd.f32 %v347_v51, %v293_v14 }
 0x162   :  { %v371_v18 = vmax.f32 %v348_v15, 0.0 }
 0x165   :  { %v362_v52 = vpop.f32.mrf.mxu2 }
 0x166   :  { %v363_v63 = vadd.f32 %v362_v52, %v318_v61 }
 0x167   :  { %v350_v53 = vpop.f32.mrf.mxu1 }
 0x168   :  { %v376_v4 = vmax.f32 %v363_v63, 0.0  ;;  %v351_v12 = vadd.f32 %v350_v53, %v298_v11 }
 0x16a   :  { %v372_v17 = vmax.f32 %v351_v12, 0.0 }
 0x16d   :  { %v365_v54 = vpop.f32.mrf.mxu2 }
 0x16e   :  { %v366_v59 = vadd.f32 %v365_v54, %v323_v57 }
 0x16f   :  { %v353_v56 = vpop.f32.mrf.mxu1 }
 0x170   :  { %v377_v2 = vmax.f32 %v366_v59, 0.0  ;;  %v354_v9 = vadd.f32 %v353_v56, %v303_v8 }
 0x172   :  { %v373_v16 = vmax.f32 %v354_v9, 0.0 }
 0x175   :  { %v368_v58 = vpop.f32.mrf.mxu2 }
 0x176   :  { %v369_v60 = vadd.f32 %v368_v58, %v328_v55 }
 0x177   :  { %v356_v62 = vpop.f32.mrf.mxu1 }
 0x178   :  { %v378_v0 = vmax.f32 %v369_v60, 0.0  ;;  %v357_v6 = vadd.f32 %v356_v62, %v308_v3 }
 0x17a   :  { %398 = vmatpush.msrb.mxu2 %v378_v0  ;;  %v374_v13 = vmax.f32 %v357_v6, 0.0 }
 0x17c   :  { %399 = vmatpush.msrb.mxu2 %v377_v2 }
 0x17e   :  { %400 = vmatpush.msrb.mxu2 %v376_v4 }
 0x17f   :  { %v359_v5 = vpop.f32.mrf.mxu1 }
 0x180   :  { %v360_v7 = vadd.f32 %v359_v5, %v313_v1 }
 0x182   :  { %v375_v10 = vmax.f32 %v360_v7, 0.0 }
 0x184   :  { %401 = vmatpush.msrb.mxu2 %v375_v10 }
 0x186   :  { %402 = vmatpush.msrb.mxu2 %v374_v13 }
 0x188   :  { %403 = vmatpush.msrb.mxu2 %v373_v16 }
 0x18a   :  { %404 = vmatpush.msrb.mxu2 %v372_v17 }
 0x18c   :  { %405 = vmatpush.msrb.mxu2 %v371_v18 }
 0x18d   :  { %445 = vmatmul.msk.f32.vlgmr.msrb.gmra.mxu2 %vm386_vm2, %v379_v19 }
 0x210   :  { %v407_v21 = vpop.f32.mrf.mxu2 }
 0x211   :  { %v408_v22 = vadd.f32 %v407_v21, %v384_v20 }
 0x213   :  { %411 = vst.msk [vmem:[#allocation2] sm:$0x7] %vm410_vm3, %v408_v22 }
 0x214   :  { %422 = dma.vmem_to_hbm [thread:$0]  %s418_s25, 64, %s420_s28, [#allocation3]  }
 0x215   :  { %492 = dma.done.wait [#allocation3], 64  }
 0x216   :  { %493 = vsyncadd [#allocation3], 4294967232 }
 0x217   :  { %427 = vsyncpa [#allocation3], 1 }

</bundles_post_ra>
